<compile_context>
chip_gen: v7x
topology: tpu7x:2x2x1
jax: 0.10.0
libtpu: 0.0.40
codegen_flags: <defaults>
</compile_context>

<pallas_src>
import jax
import jax.numpy as jnp
from jax.experimental import pallas as pl
from jax.experimental.pallas import tpu as pltpu


def _round_up(n: int, m: int) -> int:
    return ((n + m - 1) // m) * m


# --------------------------------- kernels ----------------------------------

def _noisy_linear_kernel(x_ref, wmu_ref, wsig_ref, weps_ref, b_ref, out_ref,
                         w_scratch):
    """Grid = (out-feature tiles, batch tiles).  The effective weight tile
    w = mu + sigma*eps is composed once per out-feature tile (first batch step)
    into VMEM scratch; later batch steps only do the MXU dot + bias add."""
    @pl.when(pl.program_id(1) == 0)
    def _():
        w_scratch[...] = (
            wmu_ref[...].astype(jnp.float32)
            + wsig_ref[...].astype(jnp.float32) * weps_ref[...].astype(jnp.float32)
        ).astype(w_scratch.dtype)

    y = jnp.dot(x_ref[...], w_scratch[...], preferred_element_type=jnp.float32)
    y = y + b_ref[...].astype(jnp.float32)
    out_ref[...] = y.astype(out_ref.dtype)


def _plain_linear_kernel(x_ref, wmu_ref, b_ref, out_ref):
    """use_noise=False path: y = x @ w_mu^T + b_mu.  sigma/eps are never
    shipped (1/3 the weight traffic, and no 0*Inf hazard)."""
    y = jnp.dot(x_ref[...], wmu_ref[...], preferred_element_type=jnp.float32)
    y = y + b_ref[...].astype(jnp.float32)
    out_ref[...] = y.astype(out_ref.dtype)


# ------------------------------ layout prep ---------------------------------

def prepare_noisy_linear_params(weight_mu, weight_sigma, weight_epsilon,
                                bias_mu, bias_sigma, bias_epsilon):
    """One-time layout preparation.  Call once per parameter update /
    reset_noise and CACHE the result: weights are transposed to (in, out) and
    zero-padded to (D_pad, O_pad) so the kernel's MXU operands are lane-dense
    (no in-kernel relayout, no per-forward pad/transpose HBM pass); both bias
    variants are precomputed (they are tiny)."""
    out_features, in_features = weight_mu.shape
    d_pad = _round_up(in_features, 128)
    o_pad = _round_up(out_features, 128)

    def pad_t(w):  # (O, D) -> (D_pad, O_pad), transposed for the MXU
        return jnp.pad(w.T, ((0, d_pad - in_features), (0, o_pad - out_features)))

    b_mu = jnp.pad(bias_mu, (0, o_pad - out_features)).reshape(1, o_pad)
    b_eff = jnp.pad(bias_mu + bias_sigma * bias_epsilon,
                    (0, o_pad - out_features)).reshape(1, o_pad)
    return dict(
        wmu_t=pad_t(weight_mu),
        wsig_t=pad_t(weight_sigma),
        weps_t=pad_t(weight_epsilon),
        b_mu=b_mu,
        b_eff=b_eff,
        in_features=in_features,
        out_features=out_features,
    )


# --------------------------------- forward ----------------------------------

def noisy_linear_forward(x, params, use_noise=True, block_m=512):
    """Pallas NoisyLinear forward.  x: (..., in_features); `params` comes from
    prepare_noisy_linear_params (pre-padded, pre-transposed, cached)."""
    in_features = params["in_features"]
    out_features = params["out_features"]
    wmu_t = params["wmu_t"]
    d_pad, o_pad = wmu_t.shape

    lead_shape = x.shape[:-1]
    x2 = x.reshape(-1, in_features)
    b = x2.shape[0]

    w_item = jnp.dtype(wmu_t.dtype).itemsize
    x_item = jnp.dtype(x.dtype).itemsize

    # Out-feature tile: up to 3 double-buffered weight operands + 1 composed
    # scratch ~= 7 (D_pad, TN) copies live; keep that under ~32 MiB so the
    # whole kernel fits v7x's 64 MiB VMEM with headroom.
    tn = None
    for cand in (512, 256, 128):
        if o_pad % cand == 0 and 7 * d_pad * cand * w_item <= (32 << 20):
            tn = cand
            break
    if tn is None:
        # TODO(synk): for very large in_features add a K (reduction) grid axis
        # with an f32 accumulator + pl.when init/finalize instead of keeping
        # the whole D dimension in one tile.
        tn = 128

    # Batch tile: large tiles amortize the ~0.35 us/step overhead; clamp so the
    # double-buffered x / out tiles stay small next to the weight tiles.
    tm = block_m if b >= block_m else _round_up(max(b, 1), 8)
    while tm > 8 and 2 * tm * (d_pad + tn) * max(x_item, 4) > (12 << 20):
        tm //= 2
    tm = max(_round_up(tm, 8), 8)

    b_pad = _round_up(b, tm)
    x_pad = jnp.pad(x2, ((0, b_pad - b), (0, d_pad - in_features)))

    grid = (o_pad // tn, b_pad // tm)   # (out-feature tiles, batch tiles)

    x_spec = pl.BlockSpec((tm, d_pad), lambda j, i: (i, 0))
    w_spec = pl.BlockSpec((d_pad, tn), lambda j, i: (0, j))
    b_spec = pl.BlockSpec((1, tn), lambda j, i: (0, j))
    out_spec = pl.BlockSpec((tm, tn), lambda j, i: (i, j))

    n_weight_ops = 3 if use_noise else 1
    vmem_est = (2 * tm * d_pad * x_item
                + n_weight_ops * 2 * d_pad * tn * w_item
                + (d_pad * tn * x_item if use_noise else 0)
                + 2 * tn * 4
                + 2 * tm * tn * x_item)
    vmem_limit = min(max(int(vmem_est) + (8 << 20), 32 << 20), 128 << 20)

    compiler_params = pltpu.CompilerParams(
        # Outer (out-feature) axis is embarrassingly parallel -> megacore on
        # v7x.  The inner batch axis must stay "arbitrary" so the
        # once-per-out-tile weight composition at batch step 0 is executed by
        # every core that owns an out-feature tile.
        dimension_semantics=("parallel", "arbitrary"),
        vmem_limit_bytes=vmem_limit,
    )

    if use_noise:
        out = pl.pallas_call(
            _noisy_linear_kernel,
            out_shape=jax.ShapeDtypeStruct((b_pad, o_pad), x.dtype),
            grid=grid,
            in_specs=[x_spec, w_spec, w_spec, w_spec, b_spec],
            out_specs=out_spec,
            scratch_shapes=[pltpu.VMEM((d_pad, tn), x.dtype)],
            compiler_params=compiler_params,
        )(x_pad, wmu_t, params["wsig_t"], params["weps_t"], params["b_eff"])
    else:
        out = pl.pallas_call(
            _plain_linear_kernel,
            out_shape=jax.ShapeDtypeStruct((b_pad, o_pad), x.dtype),
            grid=grid,
            in_specs=[x_spec, w_spec, b_spec],
            out_specs=out_spec,
            compiler_params=compiler_params,
        )(x_pad, wmu_t, params["b_mu"])

    return out[:b, :out_features].reshape(*lead_shape, out_features)


# ---------------- parameter / noise init (matches NoisyLinear) ----------------

def _scale_noise(key, size):
    """torch: x = randn(size); x.sign() * x.abs().sqrt() (same distribution;
    bit-exact torch RNG reproduction is not possible in JAX)."""
    x = jax.random.normal(key, (size,), jnp.float32)
    return jnp.sign(x) * jnp.sqrt(jnp.abs(x))


def init_noisy_linear(key, in_features, out_features, std_init=0.1, bias=True):
    kwmu, kbmu, kein, keout = jax.random.split(key, 4)
    mu_range = 1.0 / (in_features ** 0.5)

    weight_mu = jax.random.uniform(kwmu, (out_features, in_features),
                                   jnp.float32, -mu_range, mu_range)
    weight_sigma = jnp.full((out_features, in_features),
                            std_init / (in_features ** 0.5), jnp.float32)
    if bias:
        bias_mu = jax.random.uniform(kbmu, (out_features,), jnp.float32,
                                     -mu_range, mu_range)
        bias_sigma = jnp.full((out_features,),
                              std_init / (out_features ** 0.5), jnp.float32)
    else:
        bias_mu = jnp.zeros((out_features,), jnp.float32)
        bias_sigma = jnp.zeros((out_features,), jnp.float32)

    eps_in = _scale_noise(kein, in_features)
    eps_out = _scale_noise(keout, out_features)
    weight_epsilon = jnp.outer(eps_out, eps_in)
    bias_epsilon = eps_out
    return (weight_mu, weight_sigma, weight_epsilon,
            bias_mu, bias_sigma, bias_epsilon)


if __name__ == "__main__":
    # Small shapes consistent with NoisyLinear: batch=4, in_features=64, out=32.
    batch, in_features, out_features = 4, 64, 32
    std_init = 0.1

    key = jax.random.PRNGKey(0)
    kx, kparams = jax.random.split(key)

    x = jax.random.normal(kx, (batch, in_features), jnp.float32)
    (weight_mu, weight_sigma, weight_epsilon,
     bias_mu, bias_sigma, bias_epsilon) = init_noisy_linear(
        kparams, in_features, out_features, std_init=std_init, bias=True)

    # One-time layout prep (cache this per reset_noise / parameter update).
    params = prepare_noisy_linear_params(weight_mu, weight_sigma, weight_epsilon,
                                         bias_mu, bias_sigma, bias_epsilon)

    # Noisy path (default: sampling=True in the PyTorch module).
    y_noisy = noisy_linear_forward(x, params, use_noise=True)
    y_noisy = jax.block_until_ready(y_noisy)

    # No-noise path (noise_override=False / eval without sampling).
    y_plain = noisy_linear_forward(x, params, use_noise=False)
    y_plain = jax.block_until_ready(y_plain)

    # Plain-JAX references (same math, no Pallas).
    w_eff = weight_mu + weight_sigma * weight_epsilon
    b_eff = bias_mu + bias_sigma * bias_epsilon
    ref_noisy = x @ w_eff.T + b_eff
    ref_plain = x @ weight_mu.T + bias_mu

    assert y_noisy.shape == (batch, out_features)
    assert y_plain.shape == (batch, out_features)
    assert jnp.allclose(y_noisy, ref_noisy, atol=1e-4, rtol=1e-4)
    assert jnp.allclose(y_plain, ref_plain, atol=1e-4, rtol=1e-4)

    print("KERNEL_OK")
</pallas_src>

<mosaic_0001>
module attributes {stable_mosaic.version = 11 : i64} {
  func.func @_noisy_linear_kernel(%arg0: i32, %arg1: i32, %arg2: memref<8x128xf32, #tpu.memory_space<vmem>>, %arg3: memref<128x128xf32, #tpu.memory_space<vmem>>, %arg4: memref<128x128xf32, #tpu.memory_space<vmem>>, %arg5: memref<128x128xf32, #tpu.memory_space<vmem>>, %arg6: memref<1x128xf32, #tpu.memory_space<vmem>>, %arg7: memref<8x128xf32, #tpu.memory_space<vmem>>, %arg8: memref<128x128xf32, #tpu.memory_space<vmem>>) attributes {dimension_semantics = [#tpu.dimension_semantics<parallel>, #tpu.dimension_semantics<arbitrary>], iteration_bounds = array<i64: 1, 1>, scalar_prefetch = 0 : i64, scratch_operands = 1 : i64, tpu.core_type = #tpu.core_type<tc>, window_params = [{transform_indices = @transform_0, window_bounds = array<i64: 8, 128>}, {transform_indices = @transform_1, window_bounds = array<i64: 128, 128>}, {transform_indices = @transform_2, window_bounds = array<i64: 128, 128>}, {transform_indices = @transform_3, window_bounds = array<i64: 128, 128>}, {transform_indices = @transform_4, window_bounds = array<i64: 1, 128>}, {transform_indices = @transform_5, window_bounds = array<i64: 8, 128>}]} {
    %c0_i32 = arith.constant 0 : i32
    %0 = arith.cmpi eq, %arg1, %c0_i32 : i32
    %1 = arith.extui %0 : i1 to i32
    %c0_i32_0 = arith.constant 0 : i32
    %2 = arith.cmpi ne, %1, %c0_i32_0 : i32
    scf.if %2 {
      %c0_8 = arith.constant 0 : index
      %c0_9 = arith.constant 0 : index
      %10 = vector.load %arg3[%c0_8, %c0_9] : memref<128x128xf32, #tpu.memory_space<vmem>>, vector<128x128xf32>
      %c0_10 = arith.constant 0 : index
      %c0_11 = arith.constant 0 : index
      %11 = vector.load %arg4[%c0_10, %c0_11] : memref<128x128xf32, #tpu.memory_space<vmem>>, vector<128x128xf32>
      %c0_12 = arith.constant 0 : index
      %c0_13 = arith.constant 0 : index
      %12 = vector.load %arg5[%c0_12, %c0_13] : memref<128x128xf32, #tpu.memory_space<vmem>>, vector<128x128xf32>
      %13 = arith.mulf %11, %12 : vector<128x128xf32>
      %14 = arith.addf %10, %13 : vector<128x128xf32>
      %c0_14 = arith.constant 0 : index
      %c0_15 = arith.constant 0 : index
      %15 = vector.load %arg8[%c0_14, %c0_15] : memref<128x128xf32, #tpu.memory_space<vmem>>, vector<128x128xf32>
      tpu.vector_store %arg8[%c0_14, %c0_15], %14 {strides = array<i32>} : memref<128x128xf32, #tpu.memory_space<vmem>>, vector<128x128xf32>,
    } else {
    }
    %c0 = arith.constant 0 : index
    %c0_1 = arith.constant 0 : index
    %3 = vector.load %arg2[%c0, %c0_1] : memref<8x128xf32, #tpu.memory_space<vmem>>, vector<8x128xf32>
    %c0_2 = arith.constant 0 : index
    %c0_3 = arith.constant 0 : index
    %4 = vector.load %arg8[%c0_2, %c0_3] : memref<128x128xf32, #tpu.memory_space<vmem>>, vector<128x128xf32>
    %cst = arith.constant dense<0.000000e+00> : vector<8x128xf32>
    %5 = tpu.matmul %3, %4, %cst {dimension_numbers = #tpu.dot_dimension_numbers<[1], [0], [0], [1], [0, 0, 1, 1], [], []>} : vector<8x128xf32>, vector<128x128xf32>, vector<8x128xf32> -> vector<8x128xf32>
    %c0_4 = arith.constant 0 : index
    %c0_5 = arith.constant 0 : index
    %6 = vector.load %arg6[%c0_4, %c0_5] : memref<1x128xf32, #tpu.memory_space<vmem>>, vector<1x128xf32>
    %7 = vector.broadcast %6 : vector<1x128xf32> to vector<8x128xf32>
    %8 = arith.addf %5, %7 : vector<8x128xf32>
    %c0_6 = arith.constant 0 : index
    %c0_7 = arith.constant 0 : index
    %9 = vector.load %arg7[%c0_6, %c0_7] : memref<8x128xf32, #tpu.memory_space<vmem>>, vector<8x128xf32>
    tpu.vector_store %arg7[%c0_6, %c0_7], %8 {strides = array<i32>} : memref<8x128xf32, #tpu.memory_space<vmem>>, vector<8x128xf32>,
    return
  }
  func.func @transform_0(%arg0: i32, %arg1: i32) -> (i32, i32) {
    %c0_i32 = arith.constant 0 : i32
    %c0_i32_0 = arith.constant 0 : i32
    return %arg1, %c0_i32 : i32, i32
  }
  func.func @transform_1(%arg0: i32, %arg1: i32) -> (i32, i32) {
    %c0_i32 = arith.constant 0 : i32
    %c0_i32_0 = arith.constant 0 : i32
    return %c0_i32, %arg0 : i32, i32
  }
  func.func @transform_2(%arg0: i32, %arg1: i32) -> (i32, i32) {
    %c0_i32 = arith.constant 0 : i32
    %c0_i32_0 = arith.constant 0 : i32
    return %c0_i32, %arg0 : i32, i32
  }
  func.func @transform_3(%arg0: i32, %arg1: i32) -> (i32, i32) {
    %c0_i32 = arith.constant 0 : i32
    %c0_i32_0 = arith.constant 0 : i32
    return %c0_i32, %arg0 : i32, i32
  }
  func.func @transform_4(%arg0: i32, %arg1: i32) -> (i32, i32) {
    %c0_i32 = arith.constant 0 : i32
    %c0_i32_0 = arith.constant 0 : i32
    return %c0_i32, %arg0 : i32, i32
  }
  func.func @transform_5(%arg0: i32, %arg1: i32) -> (i32, i32) {
    %c0_i32 = arith.constant 0 : i32
    return %arg1, %arg0 : i32, i32
  }
}

</mosaic_0001>

<bundles_post_ra>
// kernel: tpu_custom_call.1
= control target key start
LH: loop header
LB: loop body
LE: loop exit
PB: predicated region body
PF: predicated region fallthrough
CT: control target
= control target key end

     0   :  { %10 = vsyncpa [#allocation4], 0  ;;  %s611_s0 = inlined_call_operand.hbm [shape: f32[8,128], index: 0, kind: input, shape index: {}]   ;;  %s612_s1 = inlined_call_operand.hbm [shape: f32[128,128], index: 1, kind: input, shape index: {}]   ;;  %s613_s2 = inlined_call_operand.hbm [shape: f32[128,128], index: 2, kind: input, shape index: {}]   ;;  %s614_s3 = inlined_call_operand.hbm [shape: f32[128,128], index: 3, kind: input, shape index: {}]   ;;  %s615_s4 = inlined_call_operand.vmem [shape: f32[1,128], index: 4, kind: input, shape index: {}]   ;;  %s616_s5 = inlined_call_operand.hbm [shape: f32[8,128], index: 5, kind: output, shape index: {}]  }
   0x1   :  { %11 = vsyncpa [#allocation7], 0 }
   0x2   :  { %12 = vsyncpa [#allocation10], 0 }
   0x3   :  { %13 = vsyncpa [#allocation5], 0  ;;  %s491_s18 = smov [#allocation6]   ;;  %s373_s22 = scalar_lea.hbm %s612_s1, 2048 }
   0x4   :  { %s29_s19 = sshll.u32 %s491_s18, 4  ;;  %p374_p0 = scmp.ne.s32.totalorder %s612_s1, %s373_s22  ;;  %s30_s19 = int_to_ptr.vmem [resolvable:$true] %s29_s19 }
   0x5   :  { %p377_p1 = scmp.lt.u32.totalorder %s373_s22, %s612_s1 }
   0x7   :  { %p379_p2 = pnand %p377_p1, %p374_p0 }
   0x9   :  { %382 = shalt.err (!%p379_p2)
}
   0xa   :  { %s383_s27 = scalar_lea.vmem %s30_s19, 2048  ;;  %p388_p4 = scmp.lt.s32.totalorder %s30_s19, %s30_s19 }
   0xb   :  { %p384_p3 = scmp.ne.s32.totalorder %s30_s19, %s383_s27  ;;  %p389_p5 = scmp.lt.s32.totalorder %s383_s27, %s383_s27 }
   0xd   :  { %p390_p6 = por %p389_p5, %p388_p4 }
   0xf   :  { %p391_p7 = pnand %p390_p6, %p384_p3 }
  0x11   :  { %394 = shalt.err (!%p391_p7)
}
  0x12   :  { %s492_s28 = smov 128   ;;  %s493_s29 = smov 8  }
  0x13   :  { %35 = dma.hbm_to_vmem [thread:$0]  %s612_s1, 2048, %s30_s19, [#allocation7], %s492_s28, %s492_s28, %s493_s29  }
  0x14   :  { %s494_s7 = smov [#allocation3]   ;;  %s495_s9 = smov [#allocation8]  }
  0x15   :  { %s20_s8 = sshll.u32 %s494_s7, 4  ;;  %s41_s10 = sshll.u32 %s495_s9, 4  ;;  %s21_s8 = int_to_ptr.vmem [resolvable:$true] %s20_s8  ;;  %s42_s10 = int_to_ptr.vmem [resolvable:$true] %s41_s10 }
  0x16   :  { %s395_s13 = scalar_lea.hbm %s611_s0, 128 }
  0x17   :  { %p396_p8 = scmp.ne.s32.totalorder %s611_s0, %s395_s13  ;;  %p399_p9 = scmp.lt.u32.totalorder %s395_s13, %s611_s0 }
  0x19   :  { %p401_p10 = pnand %p399_p9, %p396_p8 }
  0x1b   :  { %404 = shalt.err (!%p401_p10)
}
  0x1c   :  { %s405_s1 = scalar_lea.vmem %s21_s8, 128  ;;  %p410_p12 = scmp.lt.s32.totalorder %s21_s8, %s21_s8 }
  0x1d   :  { %p406_p11 = scmp.ne.s32.totalorder %s21_s8, %s405_s1  ;;  %p411_p13 = scmp.lt.s32.totalorder %s405_s1, %s405_s1 }
  0x1f   :  { %p412_p0 = por %p411_p13, %p410_p12 }
  0x21   :  { %p413_p1 = pnand %p412_p0, %p406_p11 }
  0x23   :  { %416 = shalt.err (!%p413_p1)
}
  0x24   :  { %23 = dma.hbm_to_vmem [thread:$0]  %s611_s0, 128, %s21_s8, [#allocation4]  }
  0x25   :  { %s417_s22 = scalar_lea.hbm %s613_s2, 2048 }
  0x26   :  { %p418_p2 = scmp.ne.s32.totalorder %s613_s2, %s417_s22  ;;  %p421_p3 = scmp.lt.u32.totalorder %s417_s22, %s613_s2 }
  0x28   :  { %p423_p4 = pnand %p421_p3, %p418_p2 }
  0x2a   :  { %426 = shalt.err (!%p423_p4)
}
  0x2b   :  { %s427_s27 = scalar_lea.vmem %s42_s10, 2048  ;;  %p432_p6 = scmp.lt.s32.totalorder %s42_s10, %s42_s10 }
  0x2c   :  { %p428_p5 = scmp.ne.s32.totalorder %s42_s10, %s427_s27  ;;  %p433_p7 = scmp.lt.s32.totalorder %s427_s27, %s427_s27 }
  0x2e   :  { %p434_p8 = por %p433_p7, %p432_p6 }
  0x30   :  { %p435_p9 = pnand %p434_p8, %p428_p5 }
  0x32   :  { %438 = shalt.err (!%p435_p9)
}
  0x33   :  { %47 = dma.hbm_to_vmem [thread:$0]  %s613_s2, 2048, %s42_s10, [#allocation7], %s492_s28, %s492_s28, %s493_s29  }
  0x34   :  { %s496_s6 = smov [#allocation9]   ;;  %s439_s11 = scalar_lea.hbm %s614_s3, 2048 }
  0x35   :  { %s53_s7 = sshll.u32 %s496_s6, 4  ;;  %p440_p10 = scmp.ne.s32.totalorder %s614_s3, %s439_s11  ;;  %s54_s7 = int_to_ptr.vmem [resolvable:$true] %s53_s7 }
  0x36   :  { %p443_p11 = scmp.lt.u32.totalorder %s439_s11, %s614_s3 }
  0x38   :  { %p445_p12 = pnand %p443_p11, %p440_p10 }
  0x3a   :  { %448 = shalt.err (!%p445_p12)
}
  0x3b   :  { %s449_s16 = scalar_lea.vmem %s54_s7, 2048  ;;  %p454_p0 = scmp.lt.s32.totalorder %s54_s7, %s54_s7 }
  0x3c   :  { %p450_p13 = scmp.ne.s32.totalorder %s54_s7, %s449_s16  ;;  %p455_p1 = scmp.lt.s32.totalorder %s449_s16, %s449_s16 }
  0x3e   :  { %p456_p2 = por %p455_p1, %p454_p0 }
  0x40   :  { %p457_p3 = pnand %p456_p2, %p450_p13 }
  0x42   :  { %460 = shalt.err (!%p457_p3)
}
  0x43   :  { %59 = dma.hbm_to_vmem [thread:$0]  %s614_s3, 2048, %s54_s7, [#allocation10], %s492_s28, %s492_s28, %s493_s29  }
  0x44   :  { %483 = dma.done.wait [#allocation4], 128  }
  0x45   :  { %484 = vsyncadd [#allocation4], 4294967168 }
  0x46   :  { %485 = dma.done.wait [#allocation7], 4096  }
  0x47   :  { %486 = vsyncadd [#allocation7], 4294963200 }
  0x48   :  { %487 = dma.done.wait [#allocation10], 2048  }
  0x49   :  { %488 = vsyncadd [#allocation10], 4294965248  ;;  %v497_v0 = vmov 0.0|0.0   ;;  %vm498_vm0 = vmmov 0   ;;  %v499_v1 = vmov 0.0   ;;  %v78_v2 = vld [vmem:[#allocation6] sm:$0xff] }
  0x4a   :  { %339 = vmatprep.subr.bf16.mxu0 %v497_v0  ;;  %336 = vmatprep.mubr.msk.f32.mxu0 %vm498_vm0, %v499_v1  ;;  %v79_v3 = vld [vmem:[#allocation6 + $0x8] sm:$0xff]  ;;  %v94_v4 = vld [vmem:[#allocation8] sm:$0xff]  ;;  %v80_v10 = vld [vmem:[#allocation6 + $0x10] sm:$0xff]  ;;  %s500_s29 = smov [#allocation11]  }
  0x4b   :  { %v95_v5 = vld [vmem:[#allocation8 + $0x8] sm:$0xff]  ;;  %v110_v6 = vld [vmem:[#allocation9] sm:$0xff]  ;;  %v81_v11 = vld [vmem:[#allocation6 + $0x18] sm:$0xff]  ;;  %s275_s17 = sshll.u32 %s500_s29, 4  ;;  %s276_s17 = int_to_ptr.vmem [resolvable:$true] %s275_s17 }
  0x4c   :  { %v111_v7 = vld [vmem:[#allocation9 + $0x8] sm:$0xff]  ;;  %v126_v8 = vmul.f32 %v110_v6, %v94_v4  ;;  %v96_v12 = vld [vmem:[#allocation8 + $0x10] sm:$0xff]  ;;  %v97_v13 = vld [vmem:[#allocation8 + $0x18] sm:$0xff]  ;;  %s461_s1 = scalar_lea.vmem %s276_s17, 128  ;;  %p466_p5 = scmp.lt.s32.totalorder %s276_s17, %s276_s17 }
  0x4d   :  { %v127_v9 = vmul.f32 %v111_v7, %v95_v5  ;;  %v112_v14 = vld [vmem:[#allocation9 + $0x10] sm:$0xff]  ;;  %v113_v15 = vld [vmem:[#allocation9 + $0x18] sm:$0xff]  ;;  %v82_v20 = vld [vmem:[#allocation6 + $0x20] sm:$0xff]  ;;  %p462_p4 = scmp.ne.s32.totalorder %s276_s17, %s461_s1  ;;  %p467_p6 = scmp.lt.s32.totalorder %s461_s1, %s461_s1 }
  0x4e   :  { %v142_v16 = vadd.f32 %v126_v8, %v78_v2  ;;  %v128_v18 = vmul.f32 %v112_v14, %v96_v12  ;;  %v129_v19 = vmul.f32 %v113_v15, %v97_v13  ;;  %v98_v21 = vld [vmem:[#allocation8 + $0x20] sm:$0xff]  ;;  %v99_v22 = vld [vmem:[#allocation8 + $0x28] sm:$0xff]  ;;  %v100_v30 = vld [vmem:[#allocation8 + $0x30] sm:$0xff] }
  0x4f   :  { %v143_v17 = vadd.f32 %v127_v9, %v79_v3  ;;  %v114_v23 = vld [vmem:[#allocation9 + $0x20] sm:$0xff]  ;;  %v115_v24 = vld [vmem:[#allocation9 + $0x28] sm:$0xff]  ;;  %v101_v32 = vld [vmem:[#allocation8 + $0x38] sm:$0xff]  ;;  %p468_p7 = por %p467_p6, %p466_p5 }
  0x50   :  { %v144_v26 = vadd.f32 %v128_v18, %v80_v10  ;;  %v145_v27 = vadd.f32 %v129_v19, %v81_v11  ;;  %v83_v28 = vld [vmem:[#allocation6 + $0x28] sm:$0xff]  ;;  %v130_v29 = vmul.f32 %v114_v23, %v98_v21  ;;  %v131_v31 = vmul.f32 %v115_v24, %v99_v22  ;;  %v116_v33 = vld [vmem:[#allocation9 + $0x30] sm:$0xff]  ;;  %v117_v34 = vld [vmem:[#allocation9 + $0x38] sm:$0xff] }
  0x51   :  { %v340_v25 = vpack.c.bf16 %v143_v17, %v142_v16  ;;  %v84_v37 = vld [vmem:[#allocation6 + $0x30] sm:$0xff]  ;;  %v85_v38 = vld [vmem:[#allocation6 + $0x38] sm:$0xff]  ;;  %v132_v39 = vmul.f32 %v116_v33, %v100_v30  ;;  %v133_v40 = vmul.f32 %v117_v34, %v101_v32  ;;  %v102_v41 = vld [vmem:[#allocation8 + $0x40] sm:$0xff]  ;;  %p469_p8 = pnand %p468_p7, %p462_p4 }
  0x52   :  { %v343_v35 = vpack.c.bf16 %v145_v27, %v144_v26  ;;  %v146_v36 = vadd.f32 %v130_v29, %v82_v20  ;;  %v147_v42 = vadd.f32 %v131_v31, %v83_v28  ;;  %v103_v43 = vld [vmem:[#allocation8 + $0x48] sm:$0xff]  ;;  %v118_v44 = vld [vmem:[#allocation9 + $0x40] sm:$0xff]  ;;  %v104_v53 = vld [vmem:[#allocation8 + $0x50] sm:$0xff] }
  0x53   :  { %341 = vmatpush3.bf16.msra.mxu0 %v340_v25  ;;  %v119_v45 = vld [vmem:[#allocation9 + $0x48] sm:$0xff]  ;;  %v148_v46 = vadd.f32 %v132_v39, %v84_v37  ;;  %v149_v47 = vadd.f32 %v133_v40, %v85_v38  ;;  %v86_v49 = vld [vmem:[#allocation6 + $0x40] sm:$0xff]  ;;  %v134_v51 = vmul.f32 %v118_v44, %v102_v41  ;;  %v105_v54 = vld [vmem:[#allocation8 + $0x58] sm:$0xff] }
  0x54   :  { %342 = vmatprep.subr.bf16.mxu0 %v497_v0  ;;  %v346_v48 = vpack.c.bf16 %v147_v42, %v146_v36  ;;  %v87_v50 = vld [vmem:[#allocation6 + $0x48] sm:$0xff]  ;;  %v135_v52 = vmul.f32 %v119_v45, %v103_v43  ;;  %v120_v55 = vld [vmem:[#allocation9 + $0x50] sm:$0xff]  ;;  %v121_v56 = vld [vmem:[#allocation9 + $0x58] sm:$0xff] }
  0x55   :  { %v349_v57 = vpack.c.bf16 %v149_v47, %v148_v46  ;;  %v150_v58 = vadd.f32 %v134_v51, %v86_v49  ;;  %v88_v60 = vld [vmem:[#allocation6 + $0x50] sm:$0xff]  ;;  %v136_v61 = vmul.f32 %v120_v55, %v104_v53  ;;  %v137_v62 = vmul.f32 %v121_v56, %v105_v54  ;;  %v106_v63 = vld [vmem:[#allocation8 + $0x60] sm:$0xff]  ;;  %v89_v2 = vld [vmem:[#allocation6 + $0x58] sm:$0xff] }
  0x56   :  { %v151_v59 = vadd.f32 %v135_v52, %v87_v50  ;;  %v122_v1 = vld [vmem:[#allocation9 + $0x60] sm:$0xff]  ;;  %v107_v3 = vld [vmem:[#allocation8 + $0x68] sm:$0xff]  ;;  %v108_v12 = vld [vmem:[#allocation8 + $0x70] sm:$0xff] }
  0x57   :  { %344 = vmatpush3.bf16.msra.mxu0 %v343_v35  ;;  %v123_v4 = vld [vmem:[#allocation9 + $0x68] sm:$0xff]  ;;  %v138_v5 = vmul.f32 %v122_v1, %v106_v63  ;;  %v152_v7 = vadd.f32 %v136_v61, %v88_v60  ;;  %v153_v8 = vadd.f32 %v137_v62, %v89_v2  ;;  %v90_v9 = vld [vmem:[#allocation6 + $0x60] sm:$0xff]  ;;  %v109_v13 = vld [vmem:[#allocation8 + $0x78] sm:$0xff] }
  0x58   :  { %345 = vmatprep.subr.bf16.mxu0 %v497_v0  ;;  %v352_v6 = vpack.c.bf16 %v151_v59, %v150_v58  ;;  %v91_v10 = vld [vmem:[#allocation6 + $0x68] sm:$0xff]  ;;  %v139_v11 = vmul.f32 %v123_v4, %v107_v3  ;;  %v124_v14 = vld [vmem:[#allocation9 + $0x70] sm:$0xff]  ;;  %v125_v15 = vld [vmem:[#allocation9 + $0x78] sm:$0xff] }
  0x59   :  { %v154_v16 = vadd.f32 %v138_v5, %v90_v9  ;;  %v355_v17 = vpack.c.bf16 %v153_v8, %v152_v7  ;;  %v140_v19 = vmul.f32 %v124_v14, %v108_v12  ;;  %v141_v20 = vmul.f32 %v125_v15, %v109_v13  ;;  %v92_v21 = vld [vmem:[#allocation6 + $0x70] sm:$0xff]  ;;  %v93_v22 = vld [vmem:[#allocation6 + $0x78] sm:$0xff] }
  0x5a   :  { %v155_v18 = vadd.f32 %v139_v11, %v91_v10  ;;  %v174_v27 = vld [vmem:[#allocation3] sm:$0xff] }
  0x5b   :  { %347 = vmatpush3.bf16.msra.mxu0 %v346_v48  ;;  %v156_v24 = vadd.f32 %v140_v19, %v92_v21  ;;  %v157_v25 = vadd.f32 %v141_v20, %v93_v22  ;;  %v286_v28 = vld [vmem:[%s615_s4] ss:$0 sm:$0xff] }
  0x5c   :  { %348 = vmatprep.subr.bf16.mxu0 %v497_v0  ;;  %v358_v23 = vpack.c.bf16 %v155_v18, %v154_v16 }
  0x5d   :  { %v361_v26 = vpack.c.bf16 %v157_v25, %v156_v24 }
  0x5f   :  { %350 = vmatpush3.bf16.msra.mxu0 %v349_v57 }
  0x60   :  { %351 = vmatprep.subr.bf16.mxu0 %v497_v0 }
  0x63   :  { %353 = vmatpush3.bf16.msra.mxu0 %v352_v6 }
  0x64   :  { %354 = vmatprep.subr.bf16.mxu0 %v497_v0 }
  0x67   :  { %356 = vmatpush3.bf16.msra.mxu0 %v355_v17 }
  0x68   :  { %357 = vmatprep.subr.bf16.mxu0 %v497_v0 }
  0x6b   :  { %359 = vmatpush3.bf16.msra.mxu0 %v358_v23 }
  0x6c   :  { %360 = vmatprep.subr.bf16.mxu0 %v497_v0 }
  0x6f   :  { %362 = vmatpush3.bf16.msra.mxu0 %v361_v26 }
  0x72   :  { %337 = vmatmul.mubr.f32.vlgmr.msra.gmra.mrb[0].mxu0 %v174_v27 }
 0x145   :  { %v264_v29 = vpop.f32.mrb[0].mxu0 }
 0x146   :  { %v265_v30 = vadd.f32 %v286_v28, %v264_v29  ;;  %v338_v31 = vpop.f32.mrb[1].mxu0 }
 0x148   :  { %268 = vst [vmem:[#allocation11] sm:$0xff] %v265_v30 }
 0x149   :  { %472 = shalt.err (!%p469_p8)
}
 0x14a   :  { %s473_s20 = scalar_lea.hbm %s616_s5, 128 }
 0x14b   :  { %p474_p9 = scmp.ne.s32.totalorder %s616_s5, %s473_s20  ;;  %p477_p10 = scmp.lt.u32.totalorder %s473_s20, %s616_s5 }
 0x14d   :  { %p479_p11 = pnand %p477_p10, %p474_p9 }
 0x14f   :  { %482 = shalt.err (!%p479_p11)
}
 0x150   :  { %278 = dma.vmem_to_hbm [thread:$0]  %s276_s17, 128, %s616_s5, [#allocation5]  }
 0x151   :  { %489 = dma.done.wait [#allocation5], 128  }
 0x152   :  { %490 = vsyncadd [#allocation5], 4294967168 }
 0x153   :  { %282 = vsyncpa [#allocation4], 1 }
 0x154   :  { %283 = vsyncpa [#allocation7], 1 }
 0x155   :  { %284 = vsyncpa [#allocation10], 1 }
 0x156   :  { %285 = vsyncpa [#allocation5], 1 }

</bundles_post_ra>
